<compile_context>
chip_gen: v7x
topology: tpu7x:2x2x1
jax: 0.10.0
libtpu: 0.0.40
codegen_flags: <defaults>
</compile_context>

<pallas_src>
import functools

import jax
import jax.numpy as jnp
from jax import lax
from jax.experimental import pallas as pl
from jax.experimental.pallas import tpu as pltpu


CPAD = 8  # input channels zero-padded (inside the kernel) to one aligned (8, 128) sublane tile


def _conv3x3_silu_kernel(x_ref, w_ref, m_ref, o_ref, xpad_ref, *, W, cin, bpb):
    """Processes `bpb` images per grid step.

    x_ref:    (bpb, cin, HWp)    input, channels x flattened-spatial (spatial on the lane axis)
    w_ref:    (3, Cout, 3*CPAD)  weights; group g = di+1, column = (dj+1)*CPAD + ci
    m_ref:    (8, HWp)           precomputed boundary masks, one row per non-center tap
    o_ref:    (bpb, Cout, HWp)   output
    xpad_ref: (CPAD, HWp)        VMEM scratch used for the in-kernel channel pad cin -> CPAD
    """
    HWp = x_ref.shape[-1]

    # Zero the channel-padding rows once per grid step; rows [cin, CPAD) stay zero below.
    xpad_ref[pl.ds(cin, CPAD - cin), :] = jnp.zeros((CPAD - cin, HWp), xpad_ref.dtype)

    for b in range(bpb):
        # In-kernel channel pad 3 -> 8: masked sublane store + aligned full reload (cheap VMEM ops).
        xpad_ref[pl.ds(0, cin), :] = x_ref[b]
        xp = xpad_ref[...]                                      # (CPAD, HWp)

        acc = None
        mrow = 0
        for gi, di in enumerate((-1, 0, 1)):
            taps = []
            for dj in (-1, 0, 1):
                if di == 0 and dj == 0:
                    taps.append(xp)
                    continue
                d = di * W + dj
                # t[:, p] = xp[:, (p + d) % HWp]; wraparound positions are killed by the mask.
                t = pltpu.roll(xp, shift=(-d) % HWp, axis=1)
                taps.append(t * m_ref[pl.ds(mrow, 1), :])
                mrow += 1
            # (3*CPAD, HWp): every piece is a whole (8, lane) sublane tile, so this is layout-aligned.
            slab = jnp.concatenate(taps, axis=0)
            part = jnp.dot(w_ref[gi], slab, preferred_element_type=jnp.float32)  # (Cout, HWp)
            acc = part if acc is None else acc + part

        # Fused SiLU with one transcendental: sigmoid(y) = 0.5 * (tanh(y/2) + 1)  (EUP slot).
        act = acc * (0.5 * jnp.tanh(0.5 * acc) + 0.5)
        o_ref[b] = act.astype(o_ref.dtype)


def _is_multi_tensorcore_device():
    try:
        kind = jax.devices()[0].device_kind.lower()
    except Exception:
        return False
    return any(tok in kind for tok in ("v4", "v5p", "v7", "7x"))


def _vmem_capacity_bytes():
    try:
        return int(pltpu.get_tpu_info().vmem_capacity_bytes)
    except Exception:
        return 64 * 1024 * 1024  # conservative: v7x per-core physical VMEM


def polar_feature_extractor(x, weight, *, images_per_step=None):
    """SiLU(conv3x3(x)) with stride=1, padding=1, bias=False.

    x:      (B, in_c, H, W)
    weight: (embed_dim, in_c, 3, 3)   (PyTorch OIHW layout)
    returns (B, embed_dim, H, W)
    """
    B, Cin, H, W = x.shape
    Cout = weight.shape[0]
    assert weight.shape == (Cout, Cin, 3, 3)
    assert Cin <= CPAD

    HW = H * W
    HWp = ((HW + 127) // 128) * 128  # keep the flattened spatial (lane) axis 128-dense

    # Channels x flattened-spatial layout: a pure reshape of NCHW (no transpose, no channel pad).
    x_rows = x.reshape(B, Cin, HW)
    if HWp != HW:
        x_rows = jnp.pad(x_rows, ((0, 0), (0, 0), (0, HWp - HW)))

    # Weights as 3 row-groups of tap-major columns: w_mat[di+1, co, (dj+1)*CPAD + ci] = w[co,ci,di+1,dj+1].
    w_pad = jnp.pad(weight, ((0, 0), (0, CPAD - Cin), (0, 0), (0, 0)))  # tiny, one-time
    w_mat = jnp.transpose(w_pad, (2, 0, 3, 1)).reshape(3, Cout, 3 * CPAD)

    # Precomputed boundary masks, one row per non-center tap (hoists all iota / int-div / compare
    # chains out of the per-step path); fetched into VMEM once thanks to the constant index_map.
    p = jnp.arange(HWp, dtype=jnp.int32)
    row, col = p // W, p % W
    mask_rows = []
    for di in (-1, 0, 1):
        for dj in (-1, 0, 1):
            if di == 0 and dj == 0:
                continue
            mask_rows.append((row + di >= 0) & (row + di < H) & (col + dj >= 0) & (col + dj < W))
    masks = jnp.stack(mask_rows).astype(x.dtype)  # (8, HWp)

    # Per-step VMEM footprint: double-buffered x/out blocks + slab + acc/act + pad scratch + masks.
    def step_bytes(bpb):
        blocks = 2 * 4 * HWp * bpb * (Cin + Cout)
        temps = 4 * HWp * (3 * CPAD + 2 * Cout + CPAD + 8)
        return blocks + temps + 4 * 3 * Cout * 3 * CPAD

    vmem_cap = _vmem_capacity_bytes()
    if images_per_step is None:
        if _is_multi_tensorcore_device() and B >= 2:
            images_per_step = 1  # keep >= 2 "parallel" grid steps so both TensorCores get work
        else:
            # Single TensorCore (v5e/v6e): fold the batch -- each grid step costs ~0.35us of fixed
            # overhead, which dominates the per-image compute at small H*W.
            budget = min(int(0.4 * vmem_cap), 40 * 1024 * 1024)
            images_per_step = 1
            for cand in range(1, min(B, 8) + 1):
                if B % cand == 0 and step_bytes(cand) <= budget:
                    images_per_step = cand
    bpb = images_per_step
    assert B % bpb == 0, "images_per_step must divide the batch"
    grid = (B // bpb,)

    vmem_limit = int(min(max(2 * step_bytes(bpb), 32 * 1024 * 1024), 0.75 * vmem_cap))

    out = pl.pallas_call(
        functools.partial(_conv3x3_silu_kernel, W=W, cin=Cin, bpb=bpb),
        out_shape=jax.ShapeDtypeStruct((B, Cout, HWp), x.dtype),
        grid=grid,
        in_specs=[
            pl.BlockSpec((bpb, Cin, HWp), lambda g: (g, 0, 0)),
            pl.BlockSpec((3, Cout, 3 * CPAD), lambda g: (0, 0, 0)),
            pl.BlockSpec((8, HWp), lambda g: (0, 0)),
        ],
        out_specs=pl.BlockSpec((bpb, Cout, HWp), lambda g: (g, 0, 0)),
        scratch_shapes=[pltpu.VMEM((CPAD, HWp), x.dtype)],
        compiler_params=pltpu.CompilerParams(
            dimension_semantics=("parallel",),
            vmem_limit_bytes=vmem_limit,
        ),
    )(x_rows, w_mat, masks)
    # TODO(synk): once whole-image blocks exceed the per-generation VMEM budget (~15K spatial elems
    # on v5e's 16 MiB default, ~100K on v6e with a raised limit, ~40-48K on v7x's 64 MiB), add a
    # second "parallel" H-tiled grid axis with a 1-row halo; that axis also keeps both v7x
    # TensorCores busy when B == 1.

    if HWp != HW:
        out = out[..., :HW]
    return out.reshape(B, Cout, H, W)


def polar_feature_extractor_reference(x, weight):
    y = lax.conv_general_dilated(
        x, weight, window_strides=(1, 1), padding=((1, 1), (1, 1)),
        dimension_numbers=("NCHW", "OIHW", "NCHW"))
    return y * jax.nn.sigmoid(y)


if __name__ == "__main__":
    B, in_c, embed_dim, H, W = 2, 3, 48, 16, 16

    key = jax.random.PRNGKey(0)
    kx, kw = jax.random.split(key)
    x = jax.random.normal(kx, (B, in_c, H, W), jnp.float32)
    weight = 0.1 * jax.random.normal(kw, (embed_dim, in_c, 3, 3), jnp.float32)

    out = polar_feature_extractor(x, weight)
    out = jax.block_until_ready(out)

    ref = polar_feature_extractor_reference(x, weight)
    assert out.shape == (B, embed_dim, H, W)
    err = jnp.max(jnp.abs(out - ref))
    assert jnp.allclose(out, ref, rtol=1e-4, atol=1e-4), f"max abs err = {err}"

    print("KERNEL_OK")
</pallas_src>

<mosaic_0001>
module attributes {stable_mosaic.version = 11 : i64} {
  func.func @_conv3x3_silu_kernel(%arg0: i32, %arg1: memref<2x3x256xf32, #tpu.memory_space<vmem>>, %arg2: memref<3x48x24xf32, #tpu.memory_space<vmem>>, %arg3: memref<8x256xf32, #tpu.memory_space<vmem>>, %arg4: memref<2x48x256xf32, #tpu.memory_space<vmem>>, %arg5: memref<8x256xf32, #tpu.memory_space<vmem>>) attributes {dimension_semantics = [#tpu.dimension_semantics<parallel>], iteration_bounds = array<i64: 1>, scalar_prefetch = 0 : i64, scratch_operands = 1 : i64, tpu.core_type = #tpu.core_type<tc>, window_params = [{transform_indices = @transform_0, window_bounds = array<i64: 2, 3, 256>}, {pipeline_mode = #tpu.pipeline_mode<synchronous>, transform_indices = @transform_1, window_bounds = array<i64: 3, 48, 24>}, {pipeline_mode = #tpu.pipeline_mode<synchronous>, transform_indices = @transform_2, window_bounds = array<i64: 8, 256>}, {transform_indices = @transform_3, window_bounds = array<i64: 2, 48, 256>}]} {
    %cst = arith.constant 0.000000e+00 : f32
    %0 = vector.broadcast %cst : f32 to vector<5x256xf32>
    %c3 = arith.constant 3 : index
    %c0 = arith.constant 0 : index
    %1 = vector.load %arg5[%c3, %c0] : memref<8x256xf32, #tpu.memory_space<vmem>>, vector<5x256xf32>
    tpu.vector_store %arg5[%c3, %c0], %0 {strides = array<i32>} : memref<8x256xf32, #tpu.memory_space<vmem>>, vector<5x256xf32>,
    %c0_0 = arith.constant 0 : index
    %c0_1 = arith.constant 0 : index
    %c0_2 = arith.constant 0 : index
    %2 = vector.load %arg1[%c0_0, %c0_1, %c0_2] : memref<2x3x256xf32, #tpu.memory_space<vmem>>, vector<1x3x256xf32>
    %3 = vector.shape_cast %2 : vector<1x3x256xf32> to vector<3x256xf32>
    %c0_3 = arith.constant 0 : index
    %c0_4 = arith.constant 0 : index
    %4 = vector.load %arg5[%c0_3, %c0_4] : memref<8x256xf32, #tpu.memory_space<vmem>>, vector<3x256xf32>
    tpu.vector_store %arg5[%c0_3, %c0_4], %3 {strides = array<i32>} : memref<8x256xf32, #tpu.memory_space<vmem>>, vector<3x256xf32>,
    %c0_5 = arith.constant 0 : index
    %c0_6 = arith.constant 0 : index
    %5 = vector.load %arg5[%c0_5, %c0_6] : memref<8x256xf32, #tpu.memory_space<vmem>>, vector<8x256xf32>
    %c17_i32 = arith.constant 17 : i32
    %6 = tpu.dynamic_rotate %5 by %c17_i32 dim 1 : vector<8x256xf32>, i32 -> vector<8x256xf32>
    %c0_7 = arith.constant 0 : index
    %c0_8 = arith.constant 0 : index
    %7 = vector.load %arg3[%c0_7, %c0_8] : memref<8x256xf32, #tpu.memory_space<vmem>>, vector<1x256xf32>
    %8 = vector.broadcast %7 : vector<1x256xf32> to vector<8x256xf32>
    %9 = arith.mulf %6, %8 : vector<8x256xf32>
    %c16_i32 = arith.constant 16 : i32
    %10 = tpu.dynamic_rotate %5 by %c16_i32 dim 1 : vector<8x256xf32>, i32 -> vector<8x256xf32>
    %c1 = arith.constant 1 : index
    %c0_9 = arith.constant 0 : index
    %11 = vector.load %arg3[%c1, %c0_9] : memref<8x256xf32, #tpu.memory_space<vmem>>, vector<1x256xf32>
    %12 = vector.broadcast %11 : vector<1x256xf32> to vector<8x256xf32>
    %13 = arith.mulf %10, %12 : vector<8x256xf32>
    %c15_i32 = arith.constant 15 : i32
    %14 = tpu.dynamic_rotate %5 by %c15_i32 dim 1 : vector<8x256xf32>, i32 -> vector<8x256xf32>
    %c2 = arith.constant 2 : index
    %c0_10 = arith.constant 0 : index
    %15 = vector.load %arg3[%c2, %c0_10] : memref<8x256xf32, #tpu.memory_space<vmem>>, vector<1x256xf32>
    %16 = vector.broadcast %15 : vector<1x256xf32> to vector<8x256xf32>
    %17 = arith.mulf %14, %16 : vector<8x256xf32>
    %18 = tpu.concatenate %9, %13, %17 in 0 : vector<8x256xf32>, vector<8x256xf32>, vector<8x256xf32> -> vector<24x256xf32>
    %c0_11 = arith.constant 0 : index
    %c0_12 = arith.constant 0 : index
    %c0_13 = arith.constant 0 : index
    %19 = vector.load %arg2[%c0_11, %c0_12, %c0_13] : memref<3x48x24xf32, #tpu.memory_space<vmem>>, vector<1x48x24xf32>
    %20 = vector.shape_cast %19 : vector<1x48x24xf32> to vector<48x24xf32>
    %cst_14 = arith.constant dense<0.000000e+00> : vector<48x256xf32>
    %21 = tpu.matmul %20, %18, %cst_14 {dimension_numbers = #tpu.dot_dimension_numbers<[1], [0], [0], [1], [0, 0, 1, 1], [], []>} : vector<48x24xf32>, vector<24x256xf32>, vector<48x256xf32> -> vector<48x256xf32>
    %c1_i32 = arith.constant 1 : i32
    %22 = tpu.dynamic_rotate %5 by %c1_i32 dim 1 : vector<8x256xf32>, i32 -> vector<8x256xf32>
    %c3_15 = arith.constant 3 : index
    %c0_16 = arith.constant 0 : index
    %23 = vector.load %arg3[%c3_15, %c0_16] : memref<8x256xf32, #tpu.memory_space<vmem>>, vector<1x256xf32>
    %24 = vector.broadcast %23 : vector<1x256xf32> to vector<8x256xf32>
    %25 = arith.mulf %22, %24 : vector<8x256xf32>
    %c255_i32 = arith.constant 255 : i32
    %26 = tpu.dynamic_rotate %5 by %c255_i32 dim 1 : vector<8x256xf32>, i32 -> vector<8x256xf32>
    %c4 = arith.constant 4 : index
    %c0_17 = arith.constant 0 : index
    %27 = vector.load %arg3[%c4, %c0_17] : memref<8x256xf32, #tpu.memory_space<vmem>>, vector<1x256xf32>
    %28 = vector.broadcast %27 : vector<1x256xf32> to vector<8x256xf32>
    %29 = arith.mulf %26, %28 : vector<8x256xf32>
    %30 = tpu.concatenate %25, %5, %29 in 0 : vector<8x256xf32>, vector<8x256xf32>, vector<8x256xf32> -> vector<24x256xf32>
    %c1_18 = arith.constant 1 : index
    %c0_19 = arith.constant 0 : index
    %c0_20 = arith.constant 0 : index
    %31 = vector.load %arg2[%c1_18, %c0_19, %c0_20] : memref<3x48x24xf32, #tpu.memory_space<vmem>>, vector<1x48x24xf32>
    %32 = vector.shape_cast %31 : vector<1x48x24xf32> to vector<48x24xf32>
    %cst_21 = arith.constant dense<0.000000e+00> : vector<48x256xf32>
    %33 = tpu.matmul %32, %30, %cst_21 {dimension_numbers = #tpu.dot_dimension_numbers<[1], [0], [0], [1], [0, 0, 1, 1], [], []>} : vector<48x24xf32>, vector<24x256xf32>, vector<48x256xf32> -> vector<48x256xf32>
    %34 = arith.addf %21, %33 : vector<48x256xf32>
    %c241_i32 = arith.constant 241 : i32
    %35 = tpu.dynamic_rotate %5 by %c241_i32 dim 1 : vector<8x256xf32>, i32 -> vector<8x256xf32>
    %c5 = arith.constant 5 : index
    %c0_22 = arith.constant 0 : index
    %36 = vector.load %arg3[%c5, %c0_22] : memref<8x256xf32, #tpu.memory_space<vmem>>, vector<1x256xf32>
    %37 = vector.broadcast %36 : vector<1x256xf32> to vector<8x256xf32>
    %38 = arith.mulf %35, %37 : vector<8x256xf32>
    %c240_i32 = arith.constant 240 : i32
    %39 = tpu.dynamic_rotate %5 by %c240_i32 dim 1 : vector<8x256xf32>, i32 -> vector<8x256xf32>
    %c6 = arith.constant 6 : index
    %c0_23 = arith.constant 0 : index
    %40 = vector.load %arg3[%c6, %c0_23] : memref<8x256xf32, #tpu.memory_space<vmem>>, vector<1x256xf32>
    %41 = vector.broadcast %40 : vector<1x256xf32> to vector<8x256xf32>
    %42 = arith.mulf %39, %41 : vector<8x256xf32>
    %c239_i32 = arith.constant 239 : i32
    %43 = tpu.dynamic_rotate %5 by %c239_i32 dim 1 : vector<8x256xf32>, i32 -> vector<8x256xf32>
    %c7 = arith.constant 7 : index
    %c0_24 = arith.constant 0 : index
    %44 = vector.load %arg3[%c7, %c0_24] : memref<8x256xf32, #tpu.memory_space<vmem>>, vector<1x256xf32>
    %45 = vector.broadcast %44 : vector<1x256xf32> to vector<8x256xf32>
    %46 = arith.mulf %43, %45 : vector<8x256xf32>
    %47 = tpu.concatenate %38, %42, %46 in 0 : vector<8x256xf32>, vector<8x256xf32>, vector<8x256xf32> -> vector<24x256xf32>
    %c2_25 = arith.constant 2 : index
    %c0_26 = arith.constant 0 : index
    %c0_27 = arith.constant 0 : index
    %48 = vector.load %arg2[%c2_25, %c0_26, %c0_27] : memref<3x48x24xf32, #tpu.memory_space<vmem>>, vector<1x48x24xf32>
    %49 = vector.shape_cast %48 : vector<1x48x24xf32> to vector<48x24xf32>
    %cst_28 = arith.constant dense<0.000000e+00> : vector<48x256xf32>
    %50 = tpu.matmul %49, %47, %cst_28 {dimension_numbers = #tpu.dot_dimension_numbers<[1], [0], [0], [1], [0, 0, 1, 1], [], []>} : vector<48x24xf32>, vector<24x256xf32>, vector<48x256xf32> -> vector<48x256xf32>
    %51 = arith.addf %34, %50 : vector<48x256xf32>
    %cst_29 = arith.constant 5.000000e-01 : f32
    %52 = vector.broadcast %cst_29 : f32 to vector<48x256xf32>
    %53 = arith.mulf %52, %51 : vector<48x256xf32>
    %54 = math.tanh %53 : vector<48x256xf32>
    %cst_30 = arith.constant 5.000000e-01 : f32
    %55 = vector.broadcast %cst_30 : f32 to vector<48x256xf32>
    %56 = arith.mulf %55, %54 : vector<48x256xf32>
    %cst_31 = arith.constant 5.000000e-01 : f32
    %57 = vector.broadcast %cst_31 : f32 to vector<48x256xf32>
    %58 = arith.addf %56, %57 : vector<48x256xf32>
    %59 = arith.mulf %51, %58 : vector<48x256xf32>
    %c0_32 = arith.constant 0 : index
    %c0_33 = arith.constant 0 : index
    %c0_34 = arith.constant 0 : index
    %60 = vector.load %arg4[%c0_32, %c0_33, %c0_34] : memref<2x48x256xf32, #tpu.memory_space<vmem>>, vector<1x48x256xf32>
    %61 = vector.shape_cast %60 : vector<1x48x256xf32> to vector<48x256xf32>
    %62 = vector.shape_cast %59 : vector<48x256xf32> to vector<1x48x256xf32>
    tpu.vector_store %arg4[%c0_32, %c0_33, %c0_34], %62 {strides = array<i32>} : memref<2x48x256xf32, #tpu.memory_space<vmem>>, vector<1x48x256xf32>,
    %c1_35 = arith.constant 1 : index
    %c0_36 = arith.constant 0 : index
    %c0_37 = arith.constant 0 : index
    %63 = vector.load %arg1[%c1_35, %c0_36, %c0_37] : memref<2x3x256xf32, #tpu.memory_space<vmem>>, vector<1x3x256xf32>
    %64 = vector.shape_cast %63 : vector<1x3x256xf32> to vector<3x256xf32>
    %c0_38 = arith.constant 0 : index
    %c0_39 = arith.constant 0 : index
    %65 = vector.load %arg5[%c0_38, %c0_39] : memref<8x256xf32, #tpu.memory_space<vmem>>, vector<3x256xf32>
    tpu.vector_store %arg5[%c0_38, %c0_39], %64 {strides = array<i32>} : memref<8x256xf32, #tpu.memory_space<vmem>>, vector<3x256xf32>,
    %c0_40 = arith.constant 0 : index
    %c0_41 = arith.constant 0 : index
    %66 = vector.load %arg5[%c0_40, %c0_41] : memref<8x256xf32, #tpu.memory_space<vmem>>, vector<8x256xf32>
    %c17_i32_42 = arith.constant 17 : i32
    %67 = tpu.dynamic_rotate %66 by %c17_i32_42 dim 1 : vector<8x256xf32>, i32 -> vector<8x256xf32>
    %c0_43 = arith.constant 0 : index
    %c0_44 = arith.constant 0 : index
    %68 = vector.load %arg3[%c0_43, %c0_44] : memref<8x256xf32, #tpu.memory_space<vmem>>, vector<1x256xf32>
    %69 = vector.broadcast %68 : vector<1x256xf32> to vector<8x256xf32>
    %70 = arith.mulf %67, %69 : vector<8x256xf32>
    %c16_i32_45 = arith.constant 16 : i32
    %71 = tpu.dynamic_rotate %66 by %c16_i32_45 dim 1 : vector<8x256xf32>, i32 -> vector<8x256xf32>
    %c1_46 = arith.constant 1 : index
    %c0_47 = arith.constant 0 : index
    %72 = vector.load %arg3[%c1_46, %c0_47] : memref<8x256xf32, #tpu.memory_space<vmem>>, vector<1x256xf32>
    %73 = vector.broadcast %72 : vector<1x256xf32> to vector<8x256xf32>
    %74 = arith.mulf %71, %73 : vector<8x256xf32>
    %c15_i32_48 = arith.constant 15 : i32
    %75 = tpu.dynamic_rotate %66 by %c15_i32_48 dim 1 : vector<8x256xf32>, i32 -> vector<8x256xf32>
    %c2_49 = arith.constant 2 : index
    %c0_50 = arith.constant 0 : index
    %76 = vector.load %arg3[%c2_49, %c0_50] : memref<8x256xf32, #tpu.memory_space<vmem>>, vector<1x256xf32>
    %77 = vector.broadcast %76 : vector<1x256xf32> to vector<8x256xf32>
    %78 = arith.mulf %75, %77 : vector<8x256xf32>
    %79 = tpu.concatenate %70, %74, %78 in 0 : vector<8x256xf32>, vector<8x256xf32>, vector<8x256xf32> -> vector<24x256xf32>
    %c0_51 = arith.constant 0 : index
    %c0_52 = arith.constant 0 : index
    %c0_53 = arith.constant 0 : index
    %80 = vector.load %arg2[%c0_51, %c0_52, %c0_53] : memref<3x48x24xf32, #tpu.memory_space<vmem>>, vector<1x48x24xf32>
    %81 = vector.shape_cast %80 : vector<1x48x24xf32> to vector<48x24xf32>
    %cst_54 = arith.constant dense<0.000000e+00> : vector<48x256xf32>
    %82 = tpu.matmul %81, %79, %cst_54 {dimension_numbers = #tpu.dot_dimension_numbers<[1], [0], [0], [1], [0, 0, 1, 1], [], []>} : vector<48x24xf32>, vector<24x256xf32>, vector<48x256xf32> -> vector<48x256xf32>
    %c1_i32_55 = arith.constant 1 : i32
    %83 = tpu.dynamic_rotate %66 by %c1_i32_55 dim 1 : vector<8x256xf32>, i32 -> vector<8x256xf32>
    %c3_56 = arith.constant 3 : index
    %c0_57 = arith.constant 0 : index
    %84 = vector.load %arg3[%c3_56, %c0_57] : memref<8x256xf32, #tpu.memory_space<vmem>>, vector<1x256xf32>
    %85 = vector.broadcast %84 : vector<1x256xf32> to vector<8x256xf32>
    %86 = arith.mulf %83, %85 : vector<8x256xf32>
    %c255_i32_58 = arith.constant 255 : i32
    %87 = tpu.dynamic_rotate %66 by %c255_i32_58 dim 1 : vector<8x256xf32>, i32 -> vector<8x256xf32>
    %c4_59 = arith.constant 4 : index
    %c0_60 = arith.constant 0 : index
    %88 = vector.load %arg3[%c4_59, %c0_60] : memref<8x256xf32, #tpu.memory_space<vmem>>, vector<1x256xf32>
    %89 = vector.broadcast %88 : vector<1x256xf32> to vector<8x256xf32>
    %90 = arith.mulf %87, %89 : vector<8x256xf32>
    %91 = tpu.concatenate %86, %66, %90 in 0 : vector<8x256xf32>, vector<8x256xf32>, vector<8x256xf32> -> vector<24x256xf32>
    %c1_61 = arith.constant 1 : index
    %c0_62 = arith.constant 0 : index
    %c0_63 = arith.constant 0 : index
    %92 = vector.load %arg2[%c1_61, %c0_62, %c0_63] : memref<3x48x24xf32, #tpu.memory_space<vmem>>, vector<1x48x24xf32>
    %93 = vector.shape_cast %92 : vector<1x48x24xf32> to vector<48x24xf32>
    %cst_64 = arith.constant dense<0.000000e+00> : vector<48x256xf32>
    %94 = tpu.matmul %93, %91, %cst_64 {dimension_numbers = #tpu.dot_dimension_numbers<[1], [0], [0], [1], [0, 0, 1, 1], [], []>} : vector<48x24xf32>, vector<24x256xf32>, vector<48x256xf32> -> vector<48x256xf32>
    %95 = arith.addf %82, %94 : vector<48x256xf32>
    %c241_i32_65 = arith.constant 241 : i32
    %96 = tpu.dynamic_rotate %66 by %c241_i32_65 dim 1 : vector<8x256xf32>, i32 -> vector<8x256xf32>
    %c5_66 = arith.constant 5 : index
    %c0_67 = arith.constant 0 : index
    %97 = vector.load %arg3[%c5_66, %c0_67] : memref<8x256xf32, #tpu.memory_space<vmem>>, vector<1x256xf32>
    %98 = vector.broadcast %97 : vector<1x256xf32> to vector<8x256xf32>
    %99 = arith.mulf %96, %98 : vector<8x256xf32>
    %c240_i32_68 = arith.constant 240 : i32
    %100 = tpu.dynamic_rotate %66 by %c240_i32_68 dim 1 : vector<8x256xf32>, i32 -> vector<8x256xf32>
    %c6_69 = arith.constant 6 : index
    %c0_70 = arith.constant 0 : index
    %101 = vector.load %arg3[%c6_69, %c0_70] : memref<8x256xf32, #tpu.memory_space<vmem>>, vector<1x256xf32>
    %102 = vector.broadcast %101 : vector<1x256xf32> to vector<8x256xf32>
    %103 = arith.mulf %100, %102 : vector<8x256xf32>
    %c239_i32_71 = arith.constant 239 : i32
    %104 = tpu.dynamic_rotate %66 by %c239_i32_71 dim 1 : vector<8x256xf32>, i32 -> vector<8x256xf32>
    %c7_72 = arith.constant 7 : index
    %c0_73 = arith.constant 0 : index
    %105 = vector.load %arg3[%c7_72, %c0_73] : memref<8x256xf32, #tpu.memory_space<vmem>>, vector<1x256xf32>
    %106 = vector.broadcast %105 : vector<1x256xf32> to vector<8x256xf32>
    %107 = arith.mulf %104, %106 : vector<8x256xf32>
    %108 = tpu.concatenate %99, %103, %107 in 0 : vector<8x256xf32>, vector<8x256xf32>, vector<8x256xf32> -> vector<24x256xf32>
    %c2_74 = arith.constant 2 : index
    %c0_75 = arith.constant 0 : index
    %c0_76 = arith.constant 0 : index
    %109 = vector.load %arg2[%c2_74, %c0_75, %c0_76] : memref<3x48x24xf32, #tpu.memory_space<vmem>>, vector<1x48x24xf32>
    %110 = vector.shape_cast %109 : vector<1x48x24xf32> to vector<48x24xf32>
    %cst_77 = arith.constant dense<0.000000e+00> : vector<48x256xf32>
    %111 = tpu.matmul %110, %108, %cst_77 {dimension_numbers = #tpu.dot_dimension_numbers<[1], [0], [0], [1], [0, 0, 1, 1], [], []>} : vector<48x24xf32>, vector<24x256xf32>, vector<48x256xf32> -> vector<48x256xf32>
    %112 = arith.addf %95, %111 : vector<48x256xf32>
    %cst_78 = arith.constant 5.000000e-01 : f32
    %113 = vector.broadcast %cst_78 : f32 to vector<48x256xf32>
    %114 = arith.mulf %113, %112 : vector<48x256xf32>
    %115 = math.tanh %114 : vector<48x256xf32>
    %cst_79 = arith.constant 5.000000e-01 : f32
    %116 = vector.broadcast %cst_79 : f32 to vector<48x256xf32>
    %117 = arith.mulf %116, %115 : vector<48x256xf32>
    %cst_80 = arith.constant 5.000000e-01 : f32
    %118 = vector.broadcast %cst_80 : f32 to vector<48x256xf32>
    %119 = arith.addf %117, %118 : vector<48x256xf32>
    %120 = arith.mulf %112, %119 : vector<48x256xf32>
    %c1_81 = arith.constant 1 : index
    %c0_82 = arith.constant 0 : index
    %c0_83 = arith.constant 0 : index
    %121 = vector.load %arg4[%c1_81, %c0_82, %c0_83] : memref<2x48x256xf32, #tpu.memory_space<vmem>>, vector<1x48x256xf32>
    %122 = vector.shape_cast %121 : vector<1x48x256xf32> to vector<48x256xf32>
    %123 = vector.shape_cast %120 : vector<48x256xf32> to vector<1x48x256xf32>
    tpu.vector_store %arg4[%c1_81, %c0_82, %c0_83], %123 {strides = array<i32>} : memref<2x48x256xf32, #tpu.memory_space<vmem>>, vector<1x48x256xf32>,
    return
  }
  func.func @transform_0(%arg0: i32) -> (i32, i32, i32) {
    %c0_i32 = arith.constant 0 : i32
    %c0_i32_0 = arith.constant 0 : i32
    %c0_i32_1 = arith.constant 0 : i32
    return %arg0, %c0_i32, %c0_i32_0 : i32, i32, i32
  }
  func.func @transform_1(%arg0: i32) -> (i32, i32, i32) {
    %c0_i32 = arith.constant 0 : i32
    %c0_i32_0 = arith.constant 0 : i32
    %c0_i32_1 = arith.constant 0 : i32
    %c0_i32_2 = arith.constant 0 : i32
    return %c0_i32, %c0_i32_0, %c0_i32_1 : i32, i32, i32
  }
  func.func @transform_2(%arg0: i32) -> (i32, i32) {
    %c0_i32 = arith.constant 0 : i32
    %c0_i32_0 = arith.constant 0 : i32
    %c0_i32_1 = arith.constant 0 : i32
    return %c0_i32, %c0_i32_0 : i32, i32
  }
  func.func @transform_3(%arg0: i32) -> (i32, i32, i32) {
    %c0_i32 = arith.constant 0 : i32
    %c0_i32_0 = arith.constant 0 : i32
    %c0_i32_1 = arith.constant 0 : i32
    return %arg0, %c0_i32, %c0_i32_0 : i32, i32, i32
  }
}

</mosaic_0001>

<bundles_post_ra>
// kernel: tpu_custom_call.1
= control target key start
LH: loop header
LB: loop body
LE: loop exit
PB: predicated region body
PF: predicated region fallthrough
CT: control target
= control target key end

     0   :  { %v1541_v1 = vmov 0.0   ;;  %s2013_s0 = inlined_call_operand.vmem [shape: f32[2,3,256], index: 0, kind: input, shape index: {}]   ;;  %s2014_s1 = inlined_call_operand.vmem [shape: f32[3,48,24], index: 1, kind: input, shape index: {}]   ;;  %s2015_s2 = inlined_call_operand.vmem [shape: f32[8,256], index: 2, kind: input, shape index: {}]   ;;  %s2016_s3 = inlined_call_operand.hbm [shape: f32[2,48,256], index: 3, kind: output, shape index: {}]  }
   0x1   :  { %v17_v0 = vld [vmem:[%s2013_s0] sm:$0x77]  ;;  %15 = vst [vmem:[#allocation2] sm:$0xf8] %v1541_v1  ;;  %16 = vst [vmem:[#allocation2 + $0x8] sm:$0xf8] %v1541_v1  ;;  %232 = vmatprep.mubr.f32.mxu0 %v1541_v1  ;;  %867 = vmatprep.mubr.f32.mxu1 %v1541_v1 }
   0x2   :  { %21 = vst [vmem:[#allocation2] sm:$0x7] %v17_v0  ;;  %v19_v2 = vcombine.high %v17_v0, %v17_v0 }
   0x3   :  { %8 = vsyncpa [#allocation4], 0  ;;  %v1346_v3 = vld [vmem:[%s2013_s0 + $0x8] sm:$0x77]  ;;  %s1542_s16 = smov 1   ;;  %s1543_s17 = smov 127   ;;  %v29_v9 = vlaneseq }
   0x4   :  { %22 = vst [vmem:[#allocation2 + $0x8] sm:$0x7] %v19_v2  ;;  %v667_v4 = vcombine.high %v1346_v3, %v1346_v3  ;;  %s1544_s0 = smov 17   ;;  %s1545_s18 = smov 16   ;;  %v1313_v50 = vld [vmem:[%s2014_s1 + $0x30] sm:$0xff]  ;;  %vm149_vm2 = vcmask 195584  }
   0x5   :  { %s1546_s19 = smov 15   ;;  %s1547_s20 = smov 113   ;;  %v37_v10 = vshrl.u32 %v29_v9, 7  ;;  %v1626_v11 = vand.u32 127, %v29_v9  ;;  %v1314_v58 = vld [vmem:[%s2014_s1 + $0x38] sm:$0xff] }
   0x6   :  { %s1548_s21 = smov 112   ;;  %s1549_s22 = smov 111   ;;  %v1311_v14 = vld [vmem:[%s2015_s2 + $0x3] ss:$8 sm:$0x3] }
   0x7   :  { %v1628_v12 = vsub.s32 0, %v37_v10  ;;  %v1630_v13 = vsub.s32 1, %v37_v10  ;;  %vm102_vm0 = vcmp.lt.s32.totalorder %v1626_v11, 1  ;;  %v1349_v23 = vld [vmem:[%s2015_s2 + $0x3] ss:$8 sm:$0x3] }
   0x8   :  { %v1312_v30 = vld [vmem:[%s2015_s2 + $0x4] ss:$8 sm:$0x3]  ;;  %vm124_vm1 = vcmp.lt.s32.totalorder %v1626_v11, 127  ;;  %vm31_vm3 = vcmp.lt.s32.totalorder %v1626_v11, 17  ;;  %vm52_vm4 = vcmp.lt.s32.totalorder %v1626_v11, 16 }
   0x9   :  { %v1582_v5 = vld [vmem:[#allocation2] sm:$0xff]  ;;  %v111_v16 = vrot.slane %v1311_v14, %v1628_v12  ;;  %v115_v17 = vrot.slane %v1311_v14, %v1630_v13  ;;  %v750_v28 = vrot.slane %v1349_v23, %v1628_v12  ;;  %v754_v29 = vrot.slane %v1349_v23, %v1630_v13 }
   0xa   :  { %98 = vrot.lane.b32.xlu0 %v1582_v5, %s1542_s16  ;;  %669 = vst [vmem:[#allocation2] sm:$0x7] %v1346_v3  ;;  %v133_v36 = vrot.slane %v1312_v30, %v1628_v12  ;;  %v137_v37 = vrot.slane %v1312_v30, %v1630_v13  ;;  %v1350_v39 = vld [vmem:[%s2015_s2 + $0x4] ss:$8 sm:$0x3]  ;;  %vm74_vm5 = vcmp.lt.s32.totalorder %v1626_v11, 15 }
   0xb   :  { %v1585_v6 = vld [vmem:[#allocation2 + $0x8] sm:$0xff]  ;;  %v770_v48 = vrot.slane %v1350_v39, %v1628_v12  ;;  %v774_v49 = vrot.slane %v1350_v39, %v1630_v13  ;;  %vm392_vm6 = vcmp.lt.s32.totalorder %v1626_v11, 113  ;;  %vm414_vm7 = vcmp.lt.s32.totalorder %v1626_v11, 112 }
   0xc   :  { %670 = vst [vmem:[#allocation2 + $0x8] sm:$0x7] %v667_v4  ;;  %v34_v57 = vld [vmem:[%s2015_s2] ss:$8 sm:$0x3]  ;;  %vm436_vm8 = vcmp.lt.s32.totalorder %v1626_v11, 111 }
   0xd   :  { %v1309_v59 = vld [vmem:[%s2015_s2 + $0x1] ss:$8 sm:$0x3]  ;;  %v39_v62 = vrot.slane %v34_v57, %v1628_v12  ;;  %v43_v63 = vrot.slane %v34_v57, %v1630_v13  ;;  %v1336_v11 = vld [vmem:[%s2014_s1 + $0x70] sm:$0xff] }
   0xe   :  { %100 = vrot.lane.b32.xlu0 %v1585_v6, %s1542_s16  ;;  %v61_v2 = vrot.slane %v1309_v59, %v1628_v12  ;;  %v65_v3 = vrot.slane %v1309_v59, %v1630_v13 }
  0x11   :  { %v1588_v7 = vld [vmem:[#allocation2] sm:$0xff] }
  0x12   :  { %739 = vrot.lane.b32.xlu1 %v1588_v7, %s1542_s16  ;;  %120 = vrot.lane.b32.xlu0 %v1582_v5, %s1543_s17 }
  0x13   :  { %v1592_v8 = vld [vmem:[#allocation2 + $0x8] sm:$0xff] }
  0x16   :  { %741 = vrot.lane.b32.xlu1 %v1592_v8, %s1542_s16  ;;  %759 = vrot.lane.b32.xlu0 %v1588_v7, %s1543_s17 }
  0x1a   :  { %122 = vrot.lane.b32.xlu1 %v1585_v6, %s1543_s17  ;;  %25 = vrot.lane.b32.xlu0 %v1582_v5, %s1544_s0 }
  0x1e   :  { %761 = vrot.lane.b32.xlu1 %v1592_v8, %s1543_s17  ;;  %48 = vrot.lane.b32.xlu0 %v1582_v5, %s1545_s18 }
  0x22   :  { %27 = vrot.lane.b32.xlu1 %v1585_v6, %s1544_s0  ;;  %673 = vrot.lane.b32.xlu0 %v1588_v7, %s1544_s0 }
  0x26   :  { %50 = vrot.lane.b32.xlu1 %v1585_v6, %s1545_s18  ;;  %693 = vrot.lane.b32.xlu0 %v1588_v7, %s1545_s18 }
  0x2a   :  { %675 = vrot.lane.b32.xlu1 %v1592_v8, %s1544_s0  ;;  %70 = vrot.lane.b32.xlu0 %v1582_v5, %s1546_s19 }
  0x2e   :  { %695 = vrot.lane.b32.xlu1 %v1592_v8, %s1545_s18  ;;  %713 = vrot.lane.b32.xlu0 %v1588_v7, %s1546_s19 }
  0x32   :  { %72 = vrot.lane.b32.xlu1 %v1585_v6, %s1546_s19  ;;  %388 = vrot.lane.b32.xlu0 %v1582_v5, %s1547_s20 }
  0x36   :  { %715 = vrot.lane.b32.xlu1 %v1592_v8, %s1546_s19  ;;  %410 = vrot.lane.b32.xlu0 %v1582_v5, %s1548_s21 }
  0x3a   :  { %390 = vrot.lane.b32.xlu1 %v1585_v6, %s1547_s20  ;;  %1023 = vrot.lane.b32.xlu0 %v1588_v7, %s1547_s20 }
  0x3e   :  { %412 = vrot.lane.b32.xlu1 %v1585_v6, %s1548_s21  ;;  %1043 = vrot.lane.b32.xlu0 %v1588_v7, %s1548_s21 }
  0x42   :  { %1025 = vrot.lane.b32.xlu1 %v1592_v8, %s1547_s20  ;;  %432 = vrot.lane.b32.xlu0 %v1582_v5, %s1549_s22 }
  0x46   :  { %1045 = vrot.lane.b32.xlu1 %v1592_v8, %s1548_s21  ;;  %1063 = vrot.lane.b32.xlu0 %v1588_v7, %s1549_s22 }
  0x4a   :  { %434 = vrot.lane.b32.xlu1 %v1585_v6, %s1549_s22 }
  0x4e   :  { %1065 = vrot.lane.b32.xlu1 %v1592_v8, %s1549_s22 }
  0x7c   :  { %v99_v15 = vpop.permute.xlu0 %98 }
  0x80   :  { %v101_v18 = vpop.permute.xlu0 %100 }
  0x81   :  { %v103_v19 = vsel %vm102_vm0, %v99_v15, %v101_v18  ;;  %v104_v20 = vsel %vm102_vm0, %v101_v18, %v99_v15  ;;  %v1316_v18 = vld [vmem:[%s2014_s1 + $0x48] sm:$0xff] }
  0x82   :  { %v118_v21 = vmul.f32 %v111_v16, %v104_v20  ;;  %v119_v22 = vmul.f32 %v115_v17, %v103_v19  ;;  %v679_v17 = vld [vmem:[%s2015_s2] ss:$8 sm:$0x3]  ;;  %v1347_v19 = vld [vmem:[%s2015_s2 + $0x1] ss:$8 sm:$0x3] }
  0x84   :  { %v740_v24 = vpop.permute.xlu1 %739  ;;  %v1384_v25 = vpack.c.bf16 %v1585_v6, %v119_v22  ;;  %v1386_v26 = vpack.c.bf16 %v1582_v5, %v118_v21  ;;  %v121_v27 = vpop.permute.xlu0 %120  ;;  %v1315_v5 = vld [vmem:[%s2014_s1 + $0x40] sm:$0xff] }
  0x86   :  { %1385 = vmatprep.subr.bf16.mxu0 %v1384_v25  ;;  %v688_v25 = vrot.slane %v679_v17, %v1630_v13 }
  0x87   :  { %1387 = vmatpush1.bf16.msra.mxu0 %v1386_v26  ;;  %v704_v26 = vrot.slane %v1347_v19, %v1628_v12 }
  0x88   :  { %v742_v31 = vpop.permute.xlu1 %741  ;;  %v760_v32 = vpop.permute.xlu0 %759 }
  0x89   :  { %v743_v33 = vsel %vm102_vm0, %v740_v24, %v742_v31  ;;  %v744_v34 = vsel %vm102_vm0, %v742_v31, %v740_v24  ;;  %v684_v24 = vrot.slane %v679_v17, %v1628_v12  ;;  %v1317_v31 = vld [vmem:[%s2014_s1 + $0x50] sm:$0xff] }
  0x8a   :  { %v757_v35 = vmul.f32 %v750_v28, %v744_v34  ;;  %v758_v38 = vmul.f32 %v754_v29, %v743_v33  ;;  %v1310_v28 = vld [vmem:[%s2015_s2 + $0x2] ss:$8 sm:$0x3] }
  0x8c   :  { %v123_v40 = vpop.permute.xlu1 %122  ;;  %v1396_v41 = vpack.c.bf16 %v1592_v8, %v758_v38  ;;  %v1398_v42 = vpack.c.bf16 %v1588_v7, %v757_v35  ;;  %v26_v43 = vpop.permute.xlu0 %25 }
  0x8d   :  { %v125_v44 = vsel %vm124_vm1, %v121_v27, %v123_v40  ;;  %v126_v45 = vsel %vm124_vm1, %v123_v40, %v121_v27  ;;  %v708_v27 = vrot.slane %v1347_v19, %v1630_v13 }
  0x8e   :  { %v140_v46 = vmul.f32 %v133_v36, %v125_v44  ;;  %v141_v47 = vmul.f32 %v137_v37, %v126_v45  ;;  %1397 = vmatprep.subr.bf16.mxu1 %v1396_v41  ;;  %v83_v36 = vrot.slane %v1310_v28, %v1628_v12  ;;  %v87_v37 = vrot.slane %v1310_v28, %v1630_v13 }
  0x8f   :  { %1399 = vmatpush1.bf16.msra.mxu1 %v1398_v42  ;;  %v1348_v42 = vld [vmem:[%s2015_s2 + $0x2] ss:$8 sm:$0x3] }
  0x90   :  { %172 = vmatprep.subr.mxu0 %v141_v47  ;;  %v762_v51 = vpop.permute.xlu1 %761  ;;  %v49_v52 = vpop.permute.xlu0 %48 }
  0x91   :  { %v763_v53 = vsel %vm124_vm1, %v760_v32, %v762_v51  ;;  %v764_v54 = vsel %vm124_vm1, %v762_v51, %v760_v32  ;;  %173 = vmatpush1.msra.mxu0 %v140_v46 }
  0x92   :  { %v777_v55 = vmul.f32 %v770_v48, %v763_v53  ;;  %v778_v56 = vmul.f32 %v774_v49, %v764_v54  ;;  %1319 = vmatmul.mubr.msk.f32.vlgmr.msra.gmra.mrb[0].mxu0 %vm149_vm2, %v1313_v50  ;;  %v728_v53 = vrot.slane %v1348_v42, %v1630_v13  ;;  %v92_v54 = vld [vmem:[%s2014_s1] sm:$0xff] }
  0x93   :  { %238 = vmatprep.mubr.f32.mxu0 %v1541_v1 }
  0x94   :  { %807 = vmatprep.subr.mxu1 %v778_v56  ;;  %v28_v60 = vpop.permute.xlu1 %27  ;;  %v674_v61 = vpop.permute.xlu0 %673 }
  0x95   :  { %808 = vmatpush1.msra.mxu1 %v777_v55  ;;  %v33_v0 = vsel %vm31_vm3, %v28_v60, %v26_v43  ;;  %v32_v4 = vsel %vm31_vm3, %v26_v43, %v28_v60  ;;  %v1318_v43 = vld [vmem:[%s2014_s1 + $0x58] sm:$0xff] }
  0x96   :  { %1320 = vmatmul.mubr.msk.f32.gmra.mrb[2].mxu0 %vm149_vm2, %v1314_v58  ;;  %1357 = vmatmul.mubr.msk.f32.vlgmr.msra.gmra.mrb[0].mxu1 %vm149_vm2, %v1313_v50  ;;  %v46_v8 = vmul.f32 %v39_v62, %v33_v0  ;;  %v47_v14 = vmul.f32 %v43_v63, %v32_v4  ;;  %v724_v50 = vrot.slane %v1348_v42, %v1628_v12  ;;  %v93_v62 = vld [vmem:[%s2014_s1 + $0x8] sm:$0xff] }
  0x97   :  { %244 = vmatprep.mubr.f32.mxu0 %v1541_v1  ;;  %873 = vmatprep.mubr.f32.mxu1 %v1541_v1  ;;  %v1332_v63 = vld [vmem:[%s2015_s2 + $0x6] ss:$8 sm:$0x3] }
  0x98   :  { %v51_v6 = vpop.permute.xlu1 %50  ;;  %v694_v7 = vpop.permute.xlu0 %693 }
  0x99   :  { %v53_v9 = vsel %vm52_vm4, %v49_v52, %v51_v6  ;;  %v54_v10 = vsel %vm52_vm4, %v51_v6, %v49_v52  ;;  %v427_v6 = vrot.slane %v1332_v63, %v1630_v13 }
  0x9a   :  { %v68_v15 = vmul.f32 %v61_v2, %v54_v10  ;;  %v69_v16 = vmul.f32 %v65_v3, %v53_v9  ;;  %1321 = vmatmul.mubr.msk.f32.gmra.mrb[4].mxu0 %vm149_vm2, %v1315_v5  ;;  %1358 = vmatmul.mubr.msk.f32.gmra.mrb[2].mxu1 %vm149_vm2, %v1314_v58  ;;  %v94_v9 = vld [vmem:[%s2014_s1 + $0x10] sm:$0xff] }
  0x9b   :  { %250 = vmatprep.mubr.f32.mxu0 %v1541_v1  ;;  %879 = vmatprep.mubr.f32.mxu1 %v1541_v1 }
  0x9c   :  { %v1390_v20 = vpack.c.bf16 %v68_v15, %v46_v8  ;;  %v676_v21 = vpop.permute.xlu1 %675  ;;  %v1388_v22 = vpack.c.bf16 %v69_v16, %v47_v14  ;;  %v71_v23 = vpop.permute.xlu0 %70 }
  0x9d   :  { %v677_v29 = vsel %vm31_vm3, %v674_v61, %v676_v21  ;;  %v678_v30 = vsel %vm31_vm3, %v676_v21, %v674_v61  ;;  %v1331_v61 = vld [vmem:[%s2015_s2 + $0x5] ss:$8 sm:$0x3] }
  0x9e   :  { %1322 = vmatmul.mubr.msk.f32.gmra.mrb[6].mxu0 %vm149_vm2, %v1316_v18  ;;  %1389 = vmatprep.subr.bf16.mxu0 %v1388_v22  ;;  %v691_v38 = vmul.f32 %v684_v24, %v678_v30  ;;  %v692_v39 = vmul.f32 %v688_v25, %v677_v29  ;;  %v401_v3 = vrot.slane %v1331_v61, %v1628_v12  ;;  %v95_v22 = vld [vmem:[%s2014_s1 + $0x18] sm:$0xff] }
  0x9f   :  { %1359 = vmatmul.mubr.msk.f32.gmra.mrb[4].mxu1 %vm149_vm2, %v1315_v5  ;;  %1391 = vmatpush1.bf16.msra.mxu0 %v1390_v20  ;;  %v405_v4 = vrot.slane %v1331_v61, %v1630_v13  ;;  %v423_v5 = vrot.slane %v1332_v63, %v1628_v12  ;;  %v1369_v20 = vld [vmem:[%s2015_s2 + $0x5] ss:$8 sm:$0x3] }
  0xa0   :  { %v696_v32 = vpop.permute.xlu1 %695  ;;  %256 = vmatprep.mubr.f32.mxu0 %v1541_v1  ;;  %885 = vmatprep.mubr.f32.mxu1 %v1541_v1  ;;  %v714_v33 = vpop.permute.xlu0 %713  ;;  %v1038_v28 = vrot.slane %v1369_v20, %v1630_v13  ;;  %v1335_v61 = vld [vmem:[%s2014_s1 + $0x68] sm:$0xff]  ;;  %v1338_v63 = vld [vmem:[%s2014_s1 + $0x80] sm:$0xff] }
  0xa1   :  { %v697_v34 = vsel %vm52_vm4, %v694_v7, %v696_v32  ;;  %v698_v35 = vsel %vm52_vm4, %v696_v32, %v694_v7 }
  0xa2   :  { %v711_v40 = vmul.f32 %v704_v26, %v698_v35  ;;  %v712_v41 = vmul.f32 %v708_v27, %v697_v34  ;;  %1323 = vmatmul.mubr.msk.f32.gmra.mrb[8].mxu0 %vm149_vm2, %v1317_v31  ;;  %v1034_v27 = vrot.slane %v1369_v20, %v1628_v12  ;;  %v96_v34 = vld [vmem:[%s2014_s1 + $0x20] sm:$0xff] }
  0xa3   :  { %1360 = vmatmul.mubr.msk.f32.gmra.mrb[6].mxu1 %vm149_vm2, %v1316_v18  ;;  %262 = vmatprep.mubr.f32.mxu0 %v1541_v1 }
  0xa4   :  { %v1402_v44 = vpack.c.bf16 %v711_v40, %v691_v38  ;;  %v73_v45 = vpop.permute.xlu1 %72  ;;  %891 = vmatprep.mubr.f32.mxu1 %v1541_v1  ;;  %v1400_v46 = vpack.c.bf16 %v712_v41, %v692_v39  ;;  %v389_v47 = vpop.permute.xlu0 %388 }
  0xa5   :  { %v75_v48 = vsel %vm74_vm5, %v71_v23, %v73_v45  ;;  %v76_v49 = vsel %vm74_vm5, %v73_v45, %v71_v23  ;;  %v1370_v23 = vld [vmem:[%s2015_s2 + $0x6] ss:$8 sm:$0x3]  ;;  %v1371_v45 = vld [vmem:[%s2015_s2 + $0x7] ss:$8 sm:$0x3] }
  0xa6   :  { %v90_v51 = vmul.f32 %v83_v36, %v76_v49  ;;  %v91_v52 = vmul.f32 %v87_v37, %v75_v48  ;;  %1324 = vmatmul.mubr.msk.f32.gmra.mrb[10].mxu0 %vm149_vm2, %v1318_v43  ;;  %1401 = vmatprep.subr.bf16.mxu1 %v1400_v46  ;;  %v1054_v29 = vrot.slane %v1370_v23, %v1628_v12  ;;  %v97_v46 = vld [vmem:[%s2014_s1 + $0x28] sm:$0xff] }
  0xa7   :  { %1361 = vmatmul.mubr.msk.f32.gmra.mrb[8].mxu1 %vm149_vm2, %v1317_v31  ;;  %351 = vmatprep.mubr.f32.mxu0 %v1541_v1  ;;  %v1058_v30 = vrot.slane %v1370_v23, %v1630_v13  ;;  %v1333_v31 = vld [vmem:[%s2015_s2 + $0x7] ss:$8 sm:$0x3] }
  0xa8   :  { %1403 = vmatpush1.bf16.msra.mxu1 %v1402_v44  ;;  %291 = vmatprep.subr.mxu0 %v91_v52  ;;  %v716_v55 = vpop.permute.xlu1 %715  ;;  %v411_v56 = vpop.permute.xlu0 %410  ;;  %v445_v39 = vrot.slane %v1333_v31, %v1628_v12  ;;  %v449_v40 = vrot.slane %v1333_v31, %v1630_v13  ;;  %v1074_v52 = vrot.slane %v1371_v45, %v1628_v12 }
  0xa9   :  { %v717_v57 = vsel %vm74_vm5, %v714_v33, %v716_v55  ;;  %v718_v58 = vsel %vm74_vm5, %v716_v55, %v714_v33  ;;  %292 = vmatpush1.msra.mxu0 %v90_v51  ;;  %897 = vmatprep.mubr.f32.mxu1 %v1541_v1 }
  0xaa   :  { %v731_v59 = vmul.f32 %v724_v50, %v718_v58  ;;  %v732_v60 = vmul.f32 %v728_v53, %v717_v57  ;;  %1325 = vmatmul.mubr.msk.f32.vlgmr.msra.gmra.mrb[0].mxu0 %vm149_vm2, %v92_v54  ;;  %v1334_v57 = vld [vmem:[%s2014_s1 + $0x60] sm:$0xff] }
  0xab   :  { %1362 = vmatmul.mubr.msk.f32.gmra.mrb[10].mxu1 %vm149_vm2, %v1318_v43  ;;  %357 = vmatprep.mubr.f32.mxu0 %v1541_v1 }
  0xac   :  { %926 = vmatprep.subr.mxu1 %v732_v60  ;;  %v391_v0 = vpop.permute.xlu1 %390  ;;  %986 = vmatprep.mubr.f32.mxu1 %v1541_v1  ;;  %v1024_v2 = vpop.permute.xlu0 %1023 }
  0xad   :  { %927 = vmatpush1.msra.mxu1 %v731_v59  ;;  %v393_v7 = vsel %vm392_vm6, %v389_v47, %v391_v0  ;;  %v394_v8 = vsel %vm392_vm6, %v391_v0, %v389_v47  ;;  %v1339_v0 = vld [vmem:[%s2014_s1 + $0x88] sm:$0xff] }
  0xae   :  { %1326 = vmatmul.mubr.msk.f32.gmra.mrb[2].mxu0 %vm149_vm2, %v93_v62  ;;  %v408_v16 = vmul.f32 %v401_v3, %v393_v7  ;;  %v409_v17 = vmul.f32 %v405_v4, %v394_v8 }
  0xaf   :  { %1363 = vmatmul.mubr.msk.f32.vlgmr.msra.gmra.mrb[0].mxu1 %vm149_vm2, %v92_v54  ;;  %363 = vmatprep.mubr.f32.mxu0 %v1541_v1 }
  0xb0   :  { %v413_v10 = vpop.permute.xlu1 %412  ;;  %992 = vmatprep.mubr.f32.mxu1 %v1541_v1  ;;  %v1044_v21 = vpop.permute.xlu0 %1043 }
  0xb1   :  { %v415_v14 = vsel %vm414_vm7, %v411_v56, %v413_v10  ;;  %v416_v15 = vsel %vm414_vm7, %v413_v10, %v411_v56  ;;  %v1078_v56 = vrot.slane %v1371_v45, %v1630_v13 }
  0xb2   :  { %v430_v18 = vmul.f32 %v423_v5, %v415_v14  ;;  %v431_v19 = vmul.f32 %v427_v6, %v416_v15  ;;  %1327 = vmatmul.mubr.msk.f32.gmra.mrb[4].mxu0 %vm149_vm2, %v94_v9 }
  0xb3   :  { %1364 = vmatmul.mubr.msk.f32.gmra.mrb[2].mxu1 %vm149_vm2, %v93_v62  ;;  %369 = vmatprep.mubr.f32.mxu0 %v1541_v1  ;;  %v1337_v62 = vld [vmem:[%s2014_s1 + $0x78] sm:$0xff]  ;;  %s1550_s1 = smov [#allocation3]  }
  0xb4   :  { %v1394_v24 = vpack.c.bf16 %v430_v18, %v408_v16  ;;  %v1026_v25 = vpop.permute.xlu1 %1025  ;;  %998 = vmatprep.mubr.f32.mxu1 %v1541_v1  ;;  %v1392_v26 = vpack.c.bf16 %v431_v19, %v409_v17  ;;  %v433_v36 = vpop.permute.xlu0 %432  ;;  %s1298_s9 = sshll.u32 %s1550_s1, 4  ;;  %s1299_s9 = int_to_ptr.vmem [resolvable:$true] %s1298_s9 }
  0xb5   :  { %v1027_v32 = vsel %vm392_vm6, %v1024_v2, %v1026_v25  ;;  %v1028_v33 = vsel %vm392_vm6, %v1026_v25, %v1024_v2  ;;  %s1517_s10 = scalar_lea.vmem %s1299_s9, 3072  ;;  %p1522_p1 = scmp.lt.s32.totalorder %s1299_s9, %s1299_s9 }
  0xb6   :  { %1328 = vmatmul.mubr.msk.f32.gmra.mrb[6].mxu0 %vm149_vm2, %v95_v22  ;;  %1393 = vmatprep.subr.bf16.mxu0 %v1392_v26  ;;  %v1041_v41 = vmul.f32 %v1034_v27, %v1027_v32  ;;  %v1042_v42 = vmul.f32 %v1038_v28, %v1028_v33  ;;  %p1518_p0 = scmp.ne.s32.totalorder %s1299_s9, %s1517_s10  ;;  %p1523_p2 = scmp.lt.s32.totalorder %s1517_s10, %s1517_s10 }
  0xb7   :  { %1365 = vmatmul.mubr.msk.f32.gmra.mrb[4].mxu1 %vm149_vm2, %v94_v9  ;;  %1395 = vmatpush1.bf16.msra.mxu0 %v1394_v24 }
  0xb8   :  { %v1046_v35 = vpop.permute.xlu1 %1045  ;;  %375 = vmatprep.mubr.f32.mxu0 %v1541_v1  ;;  %1004 = vmatprep.mubr.f32.mxu1 %v1541_v1  ;;  %v1064_v55 = vpop.permute.xlu0 %1063  ;;  %p1524_p3 = por %p1523_p2, %p1522_p1 }
  0xb9   :  { %v1047_v37 = vsel %vm414_vm7, %v1044_v21, %v1046_v35  ;;  %v1048_v38 = vsel %vm414_vm7, %v1046_v35, %v1044_v21 }
  0xba   :  { %v1061_v43 = vmul.f32 %v1054_v29, %v1047_v37  ;;  %v1062_v44 = vmul.f32 %v1058_v30, %v1048_v38  ;;  %1329 = vmatmul.mubr.msk.f32.gmra.mrb[8].mxu0 %vm149_vm2, %v96_v34  ;;  %p1525_p4 = pnand %p1524_p3, %p1518_p0 }
  0xbb   :  { %1366 = vmatmul.mubr.msk.f32.gmra.mrb[6].mxu1 %vm149_vm2, %v95_v22  ;;  %381 = vmatprep.mubr.f32.mxu0 %v1541_v1 }
  0xbc   :  { %v1406_v47 = vpack.c.bf16 %v1061_v43, %v1041_v41  ;;  %v435_v48 = vpop.permute.xlu1 %434  ;;  %1010 = vmatprep.mubr.f32.mxu1 %v1541_v1  ;;  %v1404_v49 = vpack.c.bf16 %v1062_v44, %v1042_v42 }
  0xbd   :  { %v437_v50 = vsel %vm436_vm8, %v433_v36, %v435_v48  ;;  %v438_v51 = vsel %vm436_vm8, %v435_v48, %v433_v36 }
  0xbe   :  { %v452_v53 = vmul.f32 %v445_v39, %v437_v50  ;;  %v453_v54 = vmul.f32 %v449_v40, %v438_v51  ;;  %1330 = vmatmul.mubr.msk.f32.gmra.mrb[10].mxu0 %vm149_vm2, %v97_v46  ;;  %1405 = vmatprep.subr.bf16.mxu1 %v1404_v49 }
  0xbf   :  { %1367 = vmatmul.mubr.msk.f32.gmra.mrb[8].mxu1 %vm149_vm2, %v96_v34  ;;  %543 = vmatprep.mubr.f32.mxu0 %v1541_v1 }
  0xc0   :  { %1407 = vmatpush1.bf16.msra.mxu1 %v1406_v47  ;;  %483 = vmatprep.subr.mxu0 %v453_v54  ;;  %v1066_v58 = vpop.permute.xlu1 %1065 }
  0xc1   :  { %v1067_v12 = vsel %vm436_vm8, %v1064_v55, %v1066_v58  ;;  %v1068_v59 = vsel %vm436_vm8, %v1066_v58, %v1064_v55  ;;  %484 = vmatpush1.msra.mxu0 %v452_v53  ;;  %1016 = vmatprep.mubr.f32.mxu1 %v1541_v1 }
  0xc2   :  { %v1081_v13 = vmul.f32 %v1074_v52, %v1067_v12  ;;  %v1082_v60 = vmul.f32 %v1078_v56, %v1068_v59  ;;  %1340 = vmatmul.mubr.msk.f32.vlgmr.msra.gmra.mrb[0].mxu0 %vm149_vm2, %v1334_v57 }
  0xc3   :  { %1368 = vmatmul.mubr.msk.f32.gmra.mrb[10].mxu1 %vm149_vm2, %v97_v46  ;;  %549 = vmatprep.mubr.f32.mxu0 %v1541_v1 }
  0xc4   :  { %1111 = vmatprep.subr.mxu1 %v1082_v60  ;;  %1171 = vmatprep.mubr.f32.mxu1 %v1541_v1 }
  0xc5   :  { %1112 = vmatpush1.msra.mxu1 %v1081_v13 }
  0xc6   :  { %1341 = vmatmul.mubr.msk.f32.gmra.mrb[2].mxu0 %vm149_vm2, %v1335_v61 }
  0xc7   :  { %1378 = vmatmul.mubr.msk.f32.vlgmr.msra.gmra.mrb[0].mxu1 %vm149_vm2, %v1334_v57  ;;  %555 = vmatprep.mubr.f32.mxu0 %v1541_v1 }
  0xc8   :  { %1177 = vmatprep.mubr.f32.mxu1 %v1541_v1 }
  0xca   :  { %1342 = vmatmul.mubr.msk.f32.gmra.mrb[4].mxu0 %vm149_vm2, %v1336_v11 }
  0xcb   :  { %1379 = vmatmul.mubr.msk.f32.gmra.mrb[2].mxu1 %vm149_vm2, %v1335_v61  ;;  %561 = vmatprep.mubr.f32.mxu0 %v1541_v1 }
  0xcc   :  { %1183 = vmatprep.mubr.f32.mxu1 %v1541_v1 }
  0xce   :  { %1343 = vmatmul.mubr.msk.f32.gmra.mrb[6].mxu0 %vm149_vm2, %v1337_v62 }
  0xcf   :  { %1380 = vmatmul.mubr.msk.f32.gmra.mrb[4].mxu1 %vm149_vm2, %v1336_v11  ;;  %567 = vmatprep.mubr.f32.mxu0 %v1541_v1 }
  0xd0   :  { %1189 = vmatprep.mubr.f32.mxu1 %v1541_v1 }
  0xd2   :  { %1344 = vmatmul.mubr.msk.f32.gmra.mrb[8].mxu0 %vm149_vm2, %v1338_v63 }
  0xd3   :  { %1381 = vmatmul.mubr.msk.f32.gmra.mrb[6].mxu1 %vm149_vm2, %v1337_v62  ;;  %573 = vmatprep.mubr.f32.mxu0 %v1541_v1 }
  0xd4   :  { %1195 = vmatprep.mubr.f32.mxu1 %v1541_v1 }
  0xd6   :  { %1345 = vmatmul.mubr.msk.f32.gmra.mrb[10].mxu0 %vm149_vm2, %v1339_v0 }
  0xd7   :  { %1382 = vmatmul.mubr.msk.f32.gmra.mrb[8].mxu1 %vm149_vm2, %v1338_v63 }
  0xd8   :  { %1201 = vmatprep.mubr.f32.mxu1 %v1541_v1 }
  0xdb   :  { %1383 = vmatmul.mubr.msk.f32.gmra.mrb[10].mxu1 %vm149_vm2, %v1339_v0 }
 0x195   :  { %v545_v2 = vpop.f32.mrb[0].mxu0 }
 0x196   :  { %v592_v3 = vmul.f32 0.5, %v545_v2  ;;  %v547_v4 = vpop.f32.mrb[1].mxu0 }
 0x197   :  { %v593_v5 = vmul.f32 0.5, %v547_v4 }
 0x198   :  { %1469 = vtanh.f32 %v592_v3 }
 0x199   :  { %1471 = vtanh.f32 %v593_v5  ;;  %v1912_v6 = vpop.f32.mrb[2].mxu0 }
 0x19a   :  { %v594_v7 = vmul.f32 0.5, %v1912_v6  ;;  %v1915_v8 = vpop.f32.mrb[0].mxu1  ;;  %v1917_v9 = vpop.f32.mrb[3].mxu0 }
 0x19b   :  { %v1220_v10 = vmul.f32 0.5, %v1915_v8  ;;  %v595_v1 = vmul.f32 0.5, %v1917_v9  ;;  %v1921_v14 = vpop.f32.mrb[1].mxu1 }
 0x19c   :  { %1473 = vtanh.f32 %v594_v7  ;;  %v1221_v15 = vmul.f32 0.5, %v1921_v14 }
 0x19d   :  { %1475 = vtanh.f32 %v1220_v10  ;;  %v1924_v16 = vpop.f32.mrb[4].mxu0 }
 0x19e   :  { %1477 = vtanh.f32 %v595_v1  ;;  %v596_v17 = vmul.f32 0.5, %v1924_v16  ;;  %v1927_v18 = vpop.f32.mrb[2].mxu1  ;;  %v1929_v19 = vpop.f32.mrb[5].mxu0 }
 0x19f   :  { %1479 = vtanh.f32 %v1221_v15  ;;  %v1222_v20 = vmul.f32 0.5, %v1927_v18  ;;  %v597_v21 = vmul.f32 0.5, %v1929_v19  ;;  %v1933_v22 = vpop.f32.mrb[3].mxu1 }
 0x1a0   :  { %1481 = vtanh.f32 %v596_v17  ;;  %v1223_v23 = vmul.f32 0.5, %v1933_v22 }
 0x1a1   :  { %1483 = vtanh.f32 %v1222_v20  ;;  %v1936_v24 = vpop.f32.mrb[6].mxu0 }
 0x1a2   :  { %v1470_v25 = vpop.eup %1469  ;;  %1485 = vtanh.f32 %v597_v21  ;;  %v598_v26 = vmul.f32 0.5, %v1936_v24  ;;  %v1939_v27 = vpop.f32.mrb[4].mxu1 }
 0x1a3   :  { %v1941_v28 = vpop.f32.mrb[7].mxu0  ;;  %v1472_v29 = vpop.eup %1471  ;;  %v616_v30 = vmul.f32 0.5, %v1470_v25  ;;  %1487 = vtanh.f32 %v1223_v23  ;;  %v1224_v31 = vmul.f32 0.5, %v1939_v27 }
 0x1a4   :  { %v599_v32 = vmul.f32 0.5, %v1941_v28  ;;  %v1945_v33 = vpop.f32.mrb[5].mxu1  ;;  %v617_v34 = vmul.f32 0.5, %v1472_v29  ;;  %1489 = vtanh.f32 %v598_v26 }
 0x1a5   :  { %v1225_v35 = vmul.f32 0.5, %v1945_v33  ;;  %v628_v36 = vadd.f32 0.5, %v616_v30  ;;  %1491 = vtanh.f32 %v1224_v31  ;;  %v1948_v37 = vpop.f32.mrb[8].mxu0 }
 0x1a6   :  { %v1474_v38 = vpop.eup %1473  ;;  %v629_v39 = vadd.f32 0.5, %v617_v34  ;;  %1493 = vtanh.f32 %v599_v32  ;;  %v600_v40 = vmul.f32 0.5, %v1948_v37  ;;  %v1951_v41 = vpop.f32.mrb[6].mxu1 }
 0x1a7   :  { %v1953_v42 = vpop.f32.mrb[9].mxu0  ;;  %v1476_v43 = vpop.eup %1475  ;;  %v640_v44 = vmul.f32 %v628_v36, %v545_v2  ;;  %v618_v45 = vmul.f32 0.5, %v1474_v38  ;;  %1495 = vtanh.f32 %v1225_v35  ;;  %v1226_v46 = vmul.f32 0.5, %v1951_v41 }
 0x1a8   :  { %v1956_v47 = vpop.f32.mrb[7].mxu1  ;;  %v1478_v48 = vpop.eup %1477  ;;  %v641_v49 = vmul.f32 %v629_v39, %v547_v4  ;;  %v1244_v50 = vmul.f32 0.5, %v1476_v43  ;;  %1497 = vtanh.f32 %v600_v40  ;;  %v601_v51 = vmul.f32 0.5, %v1953_v42 }
 0x1a9   :  { %v1480_v52 = vpop.eup %1479  ;;  %652 = vst [vmem:[#allocation3] sm:$0xff] %v640_v44  ;;  %v630_v53 = vadd.f32 0.5, %v618_v45  ;;  %v619_v54 = vmul.f32 0.5, %v1478_v48  ;;  %1499 = vtanh.f32 %v1226_v46  ;;  %v1227_v55 = vmul.f32 0.5, %v1956_v47  ;;  %v1960_v56 = vpop.f32.mrb[10].mxu0 }
 0x1aa   :  { %v1482_v57 = vpop.eup %1481  ;;  %653 = vst [vmem:[#allocation3 + $0x8] sm:$0xff] %v641_v49  ;;  %v1256_v58 = vadd.f32 0.5, %v1244_v50  ;;  %v1245_v12 = vmul.f32 0.5, %v1480_v52  ;;  %1501 = vtanh.f32 %v601_v51  ;;  %v602_v59 = vmul.f32 0.5, %v1960_v56  ;;  %v1963_v13 = vpop.f32.mrb[8].mxu1 }
 0x1ab   :  { %v1965_v60 = vpop.f32.mrb[11].mxu0  ;;  %v1484_v61 = vpop.eup %1483  ;;  %v642_v11 = vmul.f32 %v630_v53, %v1912_v6  ;;  %v631_v62 = vadd.f32 0.5, %v619_v54  ;;  %v620_v63 = vmul.f32 0.5, %v1482_v57  ;;  %1503 = vtanh.f32 %v1227_v55 }
 0x1ac   :  { %v1968_v0 = vpop.f32.mrb[9].mxu1  ;;  %v1486_v2 = vpop.eup %1485  ;;  %v1268_v3 = vmul.f32 %v1256_v58, %v1915_v8  ;;  %v1257_v4 = vadd.f32 0.5, %v1245_v12  ;;  %v1246_v5 = vmul.f32 0.5, %v1484_v61  ;;  %1505 = vtanh.f32 %v602_v59 }
 0x1ad   :  { %v1488_v7 = vpop.eup %1487  ;;  %654 = vst [vmem:[#allocation3 + $0x10] sm:$0xff] %v642_v11  ;;  %v643_v10 = vmul.f32 %v631_v62, %v1917_v9  ;;  %v632_v1 = vadd.f32 0.5, %v620_v63  ;;  %v621_v15 = vmul.f32 0.5, %v1486_v2  ;;  %v1228_v17 = vmul.f32 0.5, %v1963_v13 }
 0x1ae   :  { %v1490_v6 = vpop.eup %1489  ;;  %1281 = vst [vmem:[#allocation3 + $0x60] sm:$0xff] %v1268_v3  ;;  %v1269_v20 = vmul.f32 %v1257_v4, %v1921_v14  ;;  %v1258_v21 = vadd.f32 0.5, %v1246_v5  ;;  %v1247_v23 = vmul.f32 0.5, %v1488_v7  ;;  %v603_v25 = vmul.f32 0.5, %v1965_v60  ;;  %v1975_v8 = vpop.f32.mrb[10].mxu1 }
 0x1af   :  { %v1492_v26 = vpop.eup %1491  ;;  %655 = vst [vmem:[#allocation3 + $0x18] sm:$0xff] %v643_v10  ;;  %v644_v29 = vmul.f32 %v632_v1, %v1924_v16  ;;  %v633_v30 = vadd.f32 0.5, %v621_v15  ;;  %v622_v9 = vmul.f32 0.5, %v1490_v6  ;;  %1507 = vtanh.f32 %v1228_v17  ;;  %v1978_v31 = vpop.f32.mrb[11].mxu1 }
 0x1b0   :  { %v1494_v32 = vpop.eup %1493  ;;  %1282 = vst [vmem:[#allocation3 + $0x68] sm:$0xff] %v1269_v20  ;;  %v1270_v34 = vmul.f32 %v1258_v21, %v1927_v18  ;;  %v1259_v14 = vadd.f32 0.5, %v1247_v23  ;;  %v1248_v35 = vmul.f32 0.5, %v1492_v26  ;;  %1509 = vtanh.f32 %v603_v25 }
 0x1b1   :  { %v1496_v36 = vpop.eup %1495  ;;  %656 = vst [vmem:[#allocation3 + $0x20] sm:$0xff] %v644_v29  ;;  %v645_v38 = vmul.f32 %v633_v30, %v1929_v19  ;;  %v634_v39 = vadd.f32 0.5, %v622_v9  ;;  %v623_v40 = vmul.f32 0.5, %v1494_v32  ;;  %v1229_v16 = vmul.f32 0.5, %v1968_v0 }
 0x1b2   :  { %v1498_v43 = vpop.eup %1497  ;;  %1283 = vst [vmem:[#allocation3 + $0x70] sm:$0xff] %v1270_v34  ;;  %v1271_v44 = vmul.f32 %v1259_v14, %v1933_v22  ;;  %v1260_v45 = vadd.f32 0.5, %v1248_v35  ;;  %v1249_v46 = vmul.f32 0.5, %v1496_v36  ;;  %v1230_v48 = vmul.f32 0.5, %v1975_v8 }
 0x1b3   :  { %v1500_v18 = vpop.eup %1499  ;;  %657 = vst [vmem:[#allocation3 + $0x28] sm:$0xff] %v645_v38  ;;  %v646_v49 = vmul.f32 %v634_v39, %v1936_v24  ;;  %v635_v50 = vadd.f32 0.5, %v623_v40  ;;  %v624_v51 = vmul.f32 0.5, %v1498_v43  ;;  %1511 = vtanh.f32 %v1229_v16 }
 0x1b4   :  { %v1502_v19 = vpop.eup %1501  ;;  %1284 = vst [vmem:[#allocation3 + $0x78] sm:$0xff] %v1271_v44  ;;  %v1272_v52 = vmul.f32 %v1260_v45, %v1939_v27  ;;  %v1261_v53 = vadd.f32 0.5, %v1249_v46  ;;  %v1250_v54 = vmul.f32 0.5, %v1500_v18  ;;  %1513 = vtanh.f32 %v1230_v48 }
 0x1b5   :  { %v1504_v55 = vpop.eup %1503  ;;  %658 = vst [vmem:[#allocation3 + $0x30] sm:$0xff] %v646_v49  ;;  %v647_v22 = vmul.f32 %v635_v50, %v1941_v28  ;;  %v636_v57 = vadd.f32 0.5, %v624_v51  ;;  %v625_v58 = vmul.f32 0.5, %v1502_v19  ;;  %v1231_v12 = vmul.f32 0.5, %v1978_v31 }
 0x1b6   :  { %v1506_v59 = vpop.eup %1505  ;;  %1285 = vst [vmem:[#allocation3 + $0x80] sm:$0xff] %v1272_v52  ;;  %v1273_v24 = vmul.f32 %v1261_v53, %v1945_v33  ;;  %v1262_v61 = vadd.f32 0.5, %v1250_v54  ;;  %v1251_v11 = vmul.f32 0.5, %v1504_v55 }
 0x1b7   :  { %659 = vst [vmem:[#allocation3 + $0x38] sm:$0xff] %v647_v22  ;;  %v648_v27 = vmul.f32 %v636_v57, %v1948_v37  ;;  %v637_v62 = vadd.f32 0.5, %v625_v58  ;;  %v626_v63 = vmul.f32 0.5, %v1506_v59  ;;  %1515 = vtanh.f32 %v1231_v12 }
 0x1b8   :  { %1286 = vst [vmem:[#allocation3 + $0x88] sm:$0xff] %v1273_v24  ;;  %v1274_v2 = vmul.f32 %v1262_v61, %v1951_v41  ;;  %v1263_v28 = vadd.f32 0.5, %v1251_v11 }
 0x1b9   :  { %v1508_v3 = vpop.eup %1507  ;;  %660 = vst [vmem:[#allocation3 + $0x40] sm:$0xff] %v648_v27  ;;  %v649_v4 = vmul.f32 %v637_v62, %v1953_v42  ;;  %v638_v5 = vadd.f32 0.5, %v626_v63 }
 0x1ba   :  { %v1510_v7 = vpop.eup %1509  ;;  %1287 = vst [vmem:[#allocation3 + $0x90] sm:$0xff] %v1274_v2  ;;  %v1275_v33 = vmul.f32 %v1263_v28, %v1956_v47  ;;  %v1252_v10 = vmul.f32 0.5, %v1508_v3 }
 0x1bb   :  { %661 = vst [vmem:[#allocation3 + $0x48] sm:$0xff] %v649_v4  ;;  %v650_v37 = vmul.f32 %v638_v5, %v1960_v56  ;;  %v627_v1 = vmul.f32 0.5, %v1510_v7 }
 0x1bc   :  { %1288 = vst [vmem:[#allocation3 + $0x98] sm:$0xff] %v1275_v33  ;;  %v1264_v15 = vadd.f32 0.5, %v1252_v10 }
 0x1bd   :  { %v1512_v17 = vpop.eup %1511  ;;  %662 = vst [vmem:[#allocation3 + $0x50] sm:$0xff] %v650_v37  ;;  %v639_v41 = vadd.f32 0.5, %v627_v1 }
 0x1be   :  { %v1514_v6 = vpop.eup %1513  ;;  %v1276_v20 = vmul.f32 %v1264_v15, %v1963_v13  ;;  %v1253_v21 = vmul.f32 0.5, %v1512_v17 }
 0x1bf   :  { %v651_v42 = vmul.f32 %v639_v41, %v1965_v60  ;;  %v1254_v23 = vmul.f32 0.5, %v1514_v6 }
 0x1c0   :  { %1289 = vst [vmem:[#allocation3 + $0xa0] sm:$0xff] %v1276_v20  ;;  %v1265_v25 = vadd.f32 0.5, %v1253_v21 }
 0x1c1   :  { %v1516_v47 = vpop.eup %1515  ;;  %663 = vst [vmem:[#allocation3 + $0x58] sm:$0xff] %v651_v42  ;;  %v1266_v26 = vadd.f32 0.5, %v1254_v23 }
 0x1c2   :  { %v1277_v56 = vmul.f32 %v1265_v25, %v1968_v0  ;;  %v1255_v29 = vmul.f32 0.5, %v1516_v47 }
 0x1c3   :  { %v1278_v30 = vmul.f32 %v1266_v26, %v1975_v8 }
 0x1c4   :  { %1290 = vst [vmem:[#allocation3 + $0xa8] sm:$0xff] %v1277_v56  ;;  %v1267_v9 = vadd.f32 0.5, %v1255_v29 }
 0x1c5   :  { %1291 = vst [vmem:[#allocation3 + $0xb0] sm:$0xff] %v1278_v30 }
 0x1c6   :  { %v1279_v13 = vmul.f32 %v1267_v9, %v1978_v31 }
 0x1c8   :  { %1292 = vst [vmem:[#allocation3 + $0xb8] sm:$0xff] %v1279_v13 }
 0x1c9   :  { %1528 = shalt.err (!%p1525_p4)
}
 0x1ca   :  { %s1529_s13 = scalar_lea.hbm %s2016_s3, 3072 }
 0x1cb   :  { %p1530_p5 = scmp.ne.s32.totalorder %s2016_s3, %s1529_s13  ;;  %p1533_p6 = scmp.lt.u32.totalorder %s1529_s13, %s2016_s3 }
 0x1cd   :  { %p1535_p7 = pnand %p1533_p6, %p1530_p5 }
 0x1cf   :  { %1538 = shalt.err (!%p1535_p7)
}
 0x1d0   :  { %s1551_s0 = smov 256  }
 0x1d1   :  { %1304 = dma.vmem_to_hbm [thread:$0]  %s1299_s9, 3072, %s2016_s3, [#allocation4], %s1551_s0, %s1551_s0, %s1545_s18  }
 0x1d2   :  { %1539 = dma.done.wait [#allocation4], 3072  }
 0x1d3   :  { %1540 = vsyncadd [#allocation4], 4294964224 }
 0x1d4   :  { %1308 = vsyncpa [#allocation4], 1 }

</bundles_post_ra>
